<compile_context>
chip_gen: v6e
topology: v6e:2x2x1
jax: 0.10.0
libtpu: 0.0.40
codegen_flags: <defaults>
</compile_context>

<pallas_src>
import functools

import jax
import jax.numpy as jnp
from jax.experimental import pallas as pl
from jax.experimental.pallas import tpu as pltpu


def _asym_cauchy_kernel(x_ref, o_ref, *, alpha, beta, approx):
    x = x_ref[...].astype(jnp.float32)
    x2 = x * x
    nonneg = x >= 0.0
    coeff = jnp.where(nonneg, jnp.float32(alpha), jnp.float32(beta))
    sign = jnp.where(nonneg, jnp.float32(1.0), jnp.float32(-1.0))
    denom = 1.0 + coeff * x2
    if approx:
        inv = pl.reciprocal(denom, approx=True)   # EUP fast path
    else:
        inv = 1.0 / denom                         # exact (matches reference bit-for-bit)
    o_ref[...] = (sign * inv).astype(o_ref.dtype)


def _round_up(a, b):
    return ((a + b - 1) // b) * b


def asym_cauchy(x, alpha=1.0, beta=1.0, *, lane=1024,
                target_block_bytes=2 * 1024 * 1024, approx=False):
    """Apply AsymCauchy elementwise to a tensor of any shape via Pallas TPU."""
    orig_shape = x.shape
    orig_dtype = x.dtype
    total = x.size
    if total == 0:
        return x

    itemsize = jnp.dtype(orig_dtype).itemsize
    # Minimum sublane multiple per dtype width (f32:8, bf16:16, int8/fp8:32).
    sublane = {4: 8, 2: 16, 1: 32}.get(itemsize, 8)

    rows = pl.cdiv(total, lane)

    # Byte-targeted block rows (~target_block_bytes per block), sublane-aligned.
    block_rows = max(
        sublane, (target_block_bytes // (lane * itemsize)) // sublane * sublane)
    # Don't pad tiny tensors up to a huge block.
    block_rows = min(block_rows, _round_up(rows, sublane))
    # Keep at least 2 grid steps when the data allows (v7x: 2 TCs per chip).
    if rows >= 2 * sublane:
        half = max(sublane, (((rows + 1) // 2) // sublane) * sublane)
        block_rows = min(block_rows, half)

    rows_padded = _round_up(rows, block_rows)
    total_padded = rows_padded * lane

    flat = x.reshape(-1)
    if total_padded != total:
        flat = jnp.pad(flat, (0, total_padded - total))
    x2d = flat.reshape(rows_padded, lane)

    grid = (rows_padded // block_rows,)
    kernel = functools.partial(
        _asym_cauchy_kernel, alpha=float(alpha), beta=float(beta), approx=approx)

    out2d = pl.pallas_call(
        kernel,
        out_shape=jax.ShapeDtypeStruct((rows_padded, lane), orig_dtype),
        grid=grid,
        in_specs=[pl.BlockSpec((block_rows, lane), lambda i: (i, 0))],
        out_specs=pl.BlockSpec((block_rows, lane), lambda i: (i, 0)),
        compiler_params=pltpu.CompilerParams(
            dimension_semantics=("parallel",),
            vmem_limit_bytes=32 * 1024 * 1024,
        ),
    )(x2d)

    out_flat = out2d.reshape(-1)
    if total_padded != total:
        out_flat = out_flat[:total]
    return out_flat.reshape(orig_shape)


def asym_cauchy_ref(x, alpha=1.0, beta=1.0):
    xf = x.astype(jnp.float32)
    x2 = xf * xf
    pos = 1.0 / (1.0 + alpha * x2)
    neg = -1.0 / (1.0 + beta * x2)
    return jnp.where(xf >= 0, pos, neg).astype(x.dtype)


if __name__ == "__main__":
    key = jax.random.PRNGKey(0)

    # Small NCHW input consistent with a conv-style activation module.
    x = jax.random.normal(key, (2, 4, 16, 16), dtype=jnp.float32)
    out = jax.block_until_ready(asym_cauchy(x, alpha=1.0, beta=2.0))
    ref = asym_cauchy_ref(x, alpha=1.0, beta=2.0)
    assert out.shape == x.shape
    assert jnp.allclose(out, ref, atol=1e-6, rtol=1e-6), "mismatch vs reference (f32)"

    # Odd-sized input to exercise the pad/unpad path (elementwise op is
    # layout-invariant, so any shape must work).
    key2 = jax.random.PRNGKey(1)
    y = jax.random.normal(key2, (3, 5, 7), dtype=jnp.float32)
    out_y = jax.block_until_ready(asym_cauchy(y, alpha=0.5, beta=3.0))
    ref_y = asym_cauchy_ref(y, alpha=0.5, beta=3.0)
    assert out_y.shape == y.shape
    assert jnp.allclose(out_y, ref_y, atol=1e-6, rtol=1e-6), "mismatch vs reference (odd)"

    print("KERNEL_OK")
</pallas_src>

<mosaic_0001>
module attributes {stable_mosaic.version = 11 : i64} {
  func.func @_asym_cauchy_kernel(%arg0: i32, %arg1: memref<8x1024xf32, #tpu.memory_space<vmem>>, %arg2: memref<8x1024xf32, #tpu.memory_space<vmem>>) attributes {dimension_semantics = [#tpu.dimension_semantics<parallel>], iteration_bounds = array<i64: 1>, scalar_prefetch = 0 : i64, scratch_operands = 0 : i64, tpu.core_type = #tpu.core_type<tc>, window_params = [{transform_indices = @transform_0, window_bounds = array<i64: 8, 1024>}, {transform_indices = @transform_1, window_bounds = array<i64: 8, 1024>}]} {
    %c0 = arith.constant 0 : index
    %c0_0 = arith.constant 0 : index
    %0 = vector.load %arg1[%c0, %c0_0] : memref<8x1024xf32, #tpu.memory_space<vmem>>, vector<8x1024xf32>
    %1 = arith.mulf %0, %0 : vector<8x1024xf32>
    %cst = arith.constant 0.000000e+00 : f32
    %2 = vector.broadcast %cst : f32 to vector<8x1024xf32>
    %3 = arith.cmpf oge, %0, %2 : vector<8x1024xf32>
    %cst_1 = arith.constant 1.000000e+00 : f32
    %cst_2 = arith.constant 2.000000e+00 : f32
    %4 = vector.broadcast %cst_1 : f32 to vector<8x1024xf32>
    %5 = vector.broadcast %cst_2 : f32 to vector<8x1024xf32>
    %6 = arith.select %3, %4, %5 : vector<8x1024xi1>, vector<8x1024xf32>
    %cst_3 = arith.constant 1.000000e+00 : f32
    %cst_4 = arith.constant -1.000000e+00 : f32
    %7 = vector.broadcast %cst_3 : f32 to vector<8x1024xf32>
    %8 = vector.broadcast %cst_4 : f32 to vector<8x1024xf32>
    %9 = arith.select %3, %7, %8 : vector<8x1024xi1>, vector<8x1024xf32>
    %10 = arith.mulf %6, %1 : vector<8x1024xf32>
    %cst_5 = arith.constant 1.000000e+00 : f32
    %11 = vector.broadcast %cst_5 : f32 to vector<8x1024xf32>
    %12 = arith.addf %11, %10 : vector<8x1024xf32>
    %cst_6 = arith.constant 1.000000e+00 : f32
    %13 = vector.broadcast %cst_6 : f32 to vector<8x1024xf32>
    %14 = arith.divf %13, %12 : vector<8x1024xf32>
    %15 = arith.mulf %9, %14 : vector<8x1024xf32>
    %c0_7 = arith.constant 0 : index
    %c0_8 = arith.constant 0 : index
    %16 = vector.load %arg2[%c0_7, %c0_8] : memref<8x1024xf32, #tpu.memory_space<vmem>>, vector<8x1024xf32>
    tpu.vector_store %arg2[%c0_7, %c0_8], %15 {strides = array<i32>} : memref<8x1024xf32, #tpu.memory_space<vmem>>, vector<8x1024xf32>,
    return
  }
  func.func @transform_0(%arg0: i32) -> (i32, i32) {
    %c0_i32 = arith.constant 0 : i32
    %c0_i32_0 = arith.constant 0 : i32
    return %arg0, %c0_i32 : i32, i32
  }
  func.func @transform_1(%arg0: i32) -> (i32, i32) {
    %c0_i32 = arith.constant 0 : i32
    %c0_i32_0 = arith.constant 0 : i32
    return %arg0, %c0_i32 : i32, i32
  }
}

</mosaic_0001>

<bundles_post_ra>
// kernel: tpu_custom_call.1
= control target key start
LH: loop header
LB: loop body
LE: loop exit
PB: predicated region body
PF: predicated region fallthrough
CT: control target
= control target key end

     0   :  { %6 = vsyncpa [#allocation3], 0  ;;  %s224_s0 = inlined_call_operand.hbm [shape: f32[8,1024], index: 0, kind: input, shape index: {}]   ;;  %s225_s1 = inlined_call_operand.hbm [shape: f32[8,1024], index: 1, kind: output, shape index: {}]  }
   0x1   :  { %7 = vsyncpa [#allocation4], 0  ;;  %s188_s6 = smov [#allocation2]  }
   0x2   :  { %s14_s7 = sshll.u32 %s188_s6, 4  ;;  %s15_s7 = int_to_ptr.vmem [resolvable:$true] %s14_s7 }
   0x3   :  { %s152_s8 = scalar_lea.vmem %s15_s7, 1024  ;;  %p157_p1 = scmp.lt.s32.totalorder %s15_s7, %s15_s7 }
   0x4   :  { %p153_p0 = scmp.ne.s32.totalorder %s15_s7, %s152_s8  ;;  %p158_p2 = scmp.lt.s32.totalorder %s152_s8, %s152_s8 }
   0x6   :  { %p159_p3 = por %p158_p2, %p157_p1 }
   0x8   :  { %p160_p4 = pnand %p159_p3, %p153_p0 }
   0xa   :  { %163 = shalt.err (!%p160_p4)
}
   0xb   :  { %17 = dma.hbm_to_vmem [thread:$0]  %s224_s0, 1024, %s15_s7, [#allocation3]  }
   0xc   :  { %184 = dma.done.wait [#allocation3], 1024  }
   0xd   :  { %185 = vsyncadd [#allocation3], 4294966272  ;;  %v21_v0 = vld [vmem:[#allocation2] sm:$0xff]  ;;  %v22_v1 = vld [vmem:[#allocation2 + $0x8] sm:$0xff]  ;;  %v189_v6 = vmov 2.0   ;;  %v190_v41 = vmov -1.0  }
   0xe   :  { %v23_v2 = vld [vmem:[#allocation2 + $0x10] sm:$0xff]  ;;  %v29_v3 = vmul.f32 %v21_v0, %v21_v0  ;;  %vm37_vm0 = vcmp.ge.f32.partialorder %v21_v0, 0.0  ;;  %v30_v4 = vmul.f32 %v22_v1, %v22_v1  ;;  %vm38_vm1 = vcmp.ge.f32.partialorder %v22_v1, 0.0  ;;  %v24_v5 = vld [vmem:[#allocation2 + $0x18] sm:$0xff]  ;;  %v25_v12 = vld [vmem:[#allocation2 + $0x20] sm:$0xff]  ;;  %s191_s0 = smov [#allocation5]  }
   0xf   :  { %v45_v7 = vsel %vm37_vm0, 1.0, %v189_v6  ;;  %v46_v8 = vsel %vm38_vm1, 1.0, %v189_v6  ;;  %v31_v11 = vmul.f32 %v23_v2, %v23_v2  ;;  %vm39_vm2 = vcmp.ge.f32.partialorder %v23_v2, 0.0  ;;  %v26_v19 = vld [vmem:[#allocation2 + $0x28] sm:$0xff]  ;;  %v27_v22 = vld [vmem:[#allocation2 + $0x30] sm:$0xff]  ;;  %v28_v28 = vld [vmem:[#allocation2 + $0x38] sm:$0xff] }
  0x10   :  { %v61_v9 = vmul.f32 %v45_v7, %v29_v3  ;;  %v62_v10 = vmul.f32 %v46_v8, %v30_v4  ;;  %v47_v13 = vsel %vm39_vm2, 1.0, %v189_v6  ;;  %v32_v14 = vmul.f32 %v24_v5, %v24_v5  ;;  %s115_s11 = sshll.u32 %s191_s0, 4  ;;  %s116_s11 = int_to_ptr.vmem [resolvable:$true] %s115_s11 }
  0x11   :  { %vm40_vm3 = vcmp.ge.f32.partialorder %v24_v5, 0.0  ;;  %v63_v17 = vmul.f32 %v47_v13, %v31_v11  ;;  %v33_v21 = vmul.f32 %v25_v12, %v25_v12  ;;  %vm41_vm4 = vcmp.ge.f32.partialorder %v25_v12, 0.0  ;;  %s164_s12 = scalar_lea.vmem %s116_s11, 1024  ;;  %p169_p6 = scmp.lt.s32.totalorder %s116_s11, %s116_s11 }
  0x12   :  { %v69_v15 = vadd.f32 1.0, %v61_v9  ;;  %v70_v16 = vadd.f32 1.0, %v62_v10  ;;  %v48_v18 = vsel %vm40_vm3, 1.0, %v189_v6  ;;  %v49_v24 = vsel %vm41_vm4, 1.0, %v189_v6  ;;  %p165_p5 = scmp.ne.s32.totalorder %s116_s11, %s164_s12  ;;  %p170_p7 = scmp.lt.s32.totalorder %s164_s12, %s164_s12 }
  0x13   :  { %v64_v20 = vmul.f32 %v48_v18, %v32_v14  ;;  %v71_v23 = vadd.f32 1.0, %v63_v17  ;;  %v65_v26 = vmul.f32 %v49_v24, %v33_v21  ;;  %v34_v27 = vmul.f32 %v26_v19, %v26_v19 }
  0x14   :  { %128 = vrcp.f32 %v69_v15  ;;  %vm42_vm5 = vcmp.ge.f32.partialorder %v26_v19, 0.0  ;;  %v35_v29 = vmul.f32 %v27_v22, %v27_v22  ;;  %vm43_vm6 = vcmp.ge.f32.partialorder %v27_v22, 0.0  ;;  %p171_p8 = por %p170_p7, %p169_p6 }
  0x15   :  { %130 = vrcp.f32 %v70_v16  ;;  %v72_v25 = vadd.f32 1.0, %v64_v20  ;;  %v73_v30 = vadd.f32 1.0, %v65_v26  ;;  %v50_v31 = vsel %vm42_vm5, 1.0, %v189_v6 }
  0x16   :  { %132 = vrcp.f32 %v71_v23  ;;  %v66_v32 = vmul.f32 %v50_v31, %v34_v27  ;;  %v51_v33 = vsel %vm43_vm6, 1.0, %v189_v6  ;;  %v36_v34 = vmul.f32 %v28_v28, %v28_v28  ;;  %p172_p9 = pnand %p171_p8, %p165_p5 }
  0x17   :  { %134 = vrcp.f32 %v72_v25  ;;  %v67_v35 = vmul.f32 %v51_v33, %v35_v29  ;;  %vm44_vm7 = vcmp.ge.f32.partialorder %v28_v28, 0.0  ;;  %v53_v42 = vsel %vm37_vm0, 1.0, %v190_v41 }
  0x18   :  { %136 = vrcp.f32 %v73_v30  ;;  %v74_v36 = vadd.f32 1.0, %v66_v32  ;;  %v52_v37 = vsel %vm44_vm7, 1.0, %v189_v6  ;;  %v54_v43 = vsel %vm38_vm1, 1.0, %v190_v41 }
  0x19   :  { %v75_v38 = vadd.f32 1.0, %v67_v35  ;;  %v68_v39 = vmul.f32 %v52_v37, %v36_v34  ;;  %v55_v45 = vsel %vm39_vm2, 1.0, %v190_v41  ;;  %v56_v48 = vsel %vm40_vm3, 1.0, %v190_v41 }
  0x1a   :  { %138 = vrcp.f32 %v74_v36  ;;  %v57_v53 = vsel %vm41_vm4, 1.0, %v190_v41  ;;  %v58_v57 = vsel %vm42_vm5, 1.0, %v190_v41  ;;  %v59_v58 = vsel %vm43_vm6, 1.0, %v190_v41 }
  0x1b   :  { %140 = vrcp.f32 %v75_v38  ;;  %v76_v40 = vadd.f32 1.0, %v68_v39  ;;  %v60_v62 = vsel %vm44_vm7, 1.0, %v190_v41 }
  0x1d   :  { %142 = vrcp.f32 %v76_v40 }
  0x21   :  { %v129_v44 = vpop.eup %128 }
  0x22   :  { %v131_v46 = vpop.eup %130  ;;  %v93_v47 = vmul.f32 %v129_v44, %v53_v42 }
  0x23   :  { %v133_v49 = vpop.eup %132  ;;  %v94_v50 = vmul.f32 %v131_v46, %v54_v43 }
  0x24   :  { %v135_v51 = vpop.eup %134  ;;  %101 = vst [vmem:[#allocation5] sm:$0xff] %v93_v47  ;;  %v95_v52 = vmul.f32 %v133_v49, %v55_v45 }
  0x25   :  { %102 = vst [vmem:[#allocation5 + $0x8] sm:$0xff] %v94_v50  ;;  %v96_v54 = vmul.f32 %v135_v51, %v56_v48  ;;  %v137_v55 = vpop.eup %136 }
  0x26   :  { %103 = vst [vmem:[#allocation5 + $0x10] sm:$0xff] %v95_v52  ;;  %v97_v56 = vmul.f32 %v137_v55, %v57_v53 }
  0x27   :  { %104 = vst [vmem:[#allocation5 + $0x18] sm:$0xff] %v96_v54  ;;  %v139_v59 = vpop.eup %138 }
  0x28   :  { %105 = vst [vmem:[#allocation5 + $0x20] sm:$0xff] %v97_v56  ;;  %v141_v60 = vpop.eup %140  ;;  %v98_v61 = vmul.f32 %v139_v59, %v58_v57 }
  0x29   :  { %v99_v63 = vmul.f32 %v141_v60, %v59_v58 }
  0x2a   :  { %v143_v0 = vpop.eup %142  ;;  %106 = vst [vmem:[#allocation5 + $0x28] sm:$0xff] %v98_v61 }
  0x2b   :  { %107 = vst [vmem:[#allocation5 + $0x30] sm:$0xff] %v99_v63  ;;  %v100_v1 = vmul.f32 %v143_v0, %v60_v62 }
  0x2d   :  { %108 = vst [vmem:[#allocation5 + $0x38] sm:$0xff] %v100_v1 }
  0x2e   :  { %175 = shalt.err (!%p172_p9)
}
  0x2f   :  { %118 = dma.vmem_to_hbm [thread:$0]  %s116_s11, 1024, %s225_s1, [#allocation4]  }
  0x30   :  { %186 = dma.done.wait [#allocation4], 1024  }
  0x31   :  { %187 = vsyncadd [#allocation4], 4294966272 }
  0x32   :  { %122 = vsyncpa [#allocation3], 1 }
  0x33   :  { %123 = vsyncpa [#allocation4], 1 }

</bundles_post_ra>
